<compile_context>
chip_gen: v5e
topology: v5e:2x2
jax: 0.10.0
libtpu: 0.0.40
codegen_flags: <defaults>
</compile_context>

<pallas_src>
import jax
import jax.numpy as jnp
from jax.experimental import pallas as pl
from jax.experimental.pallas import tpu as pltpu


# ----------------------------------------------------------------------------
# Kernels
# ----------------------------------------------------------------------------

def _qkv_proj_kernel(x_ref, w_ref, o_ref):
    # x_ref: (TM, D) bf16, w_ref: (D, 3D) bf16 (scale pre-folded into Q cols).
    o_ref[...] = jnp.dot(x_ref[...], w_ref[...],
                         preferred_element_type=jnp.float32).astype(o_ref.dtype)


def _out_proj_kernel(x_ref, w_ref, b_ref, o_ref):
    # x_ref: (TM, D) bf16, w_ref: (D, D) bf16, b_ref: (1, D) f32.
    y = jnp.dot(x_ref[...], w_ref[...], preferred_element_type=jnp.float32)
    o_ref[...] = (y + b_ref[...]).astype(o_ref.dtype)


def _flash_mha_kernel(q_ref, k_ref, v_ref, o_ref, m_sc, l_sc, acc_sc):
    # q_ref: (1, H, TQ, hd) bf16 (already scaled), k_ref/v_ref: (1, H, TK, hd) bf16.
    # Online-softmax accumulation over the KV grid axis (innermost, "arbitrary").
    ki = pl.program_id(2)

    @pl.when(ki == 0)
    def _():
        m_sc[...] = jnp.full_like(m_sc, -jnp.inf)
        l_sc[...] = jnp.zeros_like(l_sc)
        acc_sc[...] = jnp.zeros_like(acc_sc)

    q = q_ref[0]                                    # (H, TQ, hd) bf16
    k = k_ref[0]                                    # (H, TK, hd) bf16
    v = v_ref[0]                                    # (H, TK, hd) bf16

    # Head-batched score matmul, f32 accumulation on the MXU.
    s = jnp.einsum("hqd,hkd->hqk", q, k,
                   preferred_element_type=jnp.float32)        # (H, TQ, TK) f32

    m_prev = m_sc[...]                              # (H, TQ, 1)
    m_new = jnp.maximum(m_prev, s.max(axis=-1, keepdims=True))
    alpha = jnp.exp(m_prev - m_new)                 # f32 elementwise (VPU/EUP)
    p = jnp.exp(s - m_new)                          # (H, TQ, TK) f32

    l_sc[...] = alpha * l_sc[...] + p.sum(axis=-1, keepdims=True)
    pv = jnp.einsum("hqk,hkd->hqd", p.astype(v.dtype), v,
                    preferred_element_type=jnp.float32)       # (H, TQ, hd) f32
    acc_sc[...] = alpha * acc_sc[...] + pv
    m_sc[...] = m_new

    @pl.when(ki == pl.num_programs(2) - 1)
    def _():
        inv_l = pl.reciprocal(l_sc[...], approx=True)         # EUP slot
        o_ref[0] = (acc_sc[...] * inv_l).astype(o_ref.dtype)


# ----------------------------------------------------------------------------
# pallas_call wrappers
# ----------------------------------------------------------------------------

def _pick_tile(n, cap=128):
    """Largest multiple-of-8 tile <= cap that divides n (else the full extent)."""
    for t in (cap, 64, 32, 16, 8):
        if t <= n and n % t == 0:
            return t
    return n


def qkv_projection(x2d_bf16, wqkv_bf16):
    BN, D = x2d_bf16.shape
    D3 = wqkv_bf16.shape[1]
    TM = _pick_tile(BN)
    return pl.pallas_call(
        _qkv_proj_kernel,
        out_shape=jax.ShapeDtypeStruct((BN, D3), jnp.bfloat16),
        grid=(BN // TM,),
        in_specs=[
            pl.BlockSpec((TM, D), lambda i: (i, 0)),
            pl.BlockSpec((D, D3), lambda i: (0, 0)),   # resident weight
        ],
        out_specs=pl.BlockSpec((TM, D3), lambda i: (i, 0)),
        compiler_params=pltpu.CompilerParams(dimension_semantics=("parallel",)),
    )(x2d_bf16, wqkv_bf16)


def out_projection(x2d_bf16, wproj_bf16, bproj):
    BN, D = x2d_bf16.shape
    TM = _pick_tile(BN)
    return pl.pallas_call(
        _out_proj_kernel,
        out_shape=jax.ShapeDtypeStruct((BN, D), jnp.float32),
        grid=(BN // TM,),
        in_specs=[
            pl.BlockSpec((TM, D), lambda i: (i, 0)),
            pl.BlockSpec((D, D), lambda i: (0, 0)),    # resident weight
            pl.BlockSpec((1, D), lambda i: (0, 0)),
        ],
        out_specs=pl.BlockSpec((TM, D), lambda i: (i, 0)),
        compiler_params=pltpu.CompilerParams(dimension_semantics=("parallel",)),
    )(x2d_bf16, wproj_bf16, bproj)


def flash_mha(q, k, v, *, q_tile=128, kv_tile=128):
    # q, k, v: (B, H, N, hd) bf16. Returns (B, H, N, hd) bf16.
    B, H, N, hd = q.shape
    TQ = q_tile if (q_tile <= N and N % q_tile == 0 and q_tile % 8 == 0) else _pick_tile(N)
    TK = kv_tile if (kv_tile <= N and N % kv_tile == 0 and kv_tile % 8 == 0) else _pick_tile(N)
    grid = (B, N // TQ, N // TK)
    return pl.pallas_call(
        _flash_mha_kernel,
        out_shape=jax.ShapeDtypeStruct((B, H, N, hd), jnp.bfloat16),
        grid=grid,
        in_specs=[
            pl.BlockSpec((1, H, TQ, hd), lambda b, qi, ki: (b, 0, qi, 0)),
            pl.BlockSpec((1, H, TK, hd), lambda b, qi, ki: (b, 0, ki, 0)),
            pl.BlockSpec((1, H, TK, hd), lambda b, qi, ki: (b, 0, ki, 0)),
        ],
        out_specs=pl.BlockSpec((1, H, TQ, hd), lambda b, qi, ki: (b, 0, qi, 0)),
        scratch_shapes=[
            pltpu.VMEM((H, TQ, 1), jnp.float32),     # running max
            pltpu.VMEM((H, TQ, 1), jnp.float32),     # running sum
            pltpu.VMEM((H, TQ, hd), jnp.float32),    # output accumulator
        ],
        compiler_params=pltpu.CompilerParams(
            dimension_semantics=("parallel", "parallel", "arbitrary")),
    )(q, k, v)


# ----------------------------------------------------------------------------
# Forward pass
# ----------------------------------------------------------------------------

def attention_forward(x, params, *, num_heads, q_tile=128, kv_tile=128):
    B, N, D = x.shape
    hd = D // num_heads
    BN = B * N

    # QKV projection on a collapsed (B*N, D) slab (bf16 MXU, f32 accumulation).
    x2d = x.reshape(BN, D).astype(jnp.bfloat16)
    qkv2d = qkv_projection(x2d, params["wqkv_bf16_scaled"])         # (BN, 3D) bf16

    # Head split — wrapper-side layout plumbing, identical to the PyTorch
    # qkv.reshape(B, N, 3, H, -1).permute(2, 0, 3, 1, 4).
    qkv = qkv2d.reshape(B, N, 3, num_heads, hd).transpose(2, 0, 3, 1, 4)
    q, k, v = qkv[0], qkv[1], qkv[2]                                 # (B, H, N, hd)

    o = flash_mha(q, k, v, q_tile=q_tile, kv_tile=kv_tile)           # (B, H, N, hd)
    o2d = o.transpose(0, 2, 1, 3).reshape(BN, D)                     # concat heads

    out2d = out_projection(o2d, params["wproj_bf16"], params["bproj"])
    return out2d.reshape(B, N, D)


# Plain-JAX f32 reference (exact softmax) matching the PyTorch forward.
def attention_reference(x, params, *, num_heads):
    B, N, D = x.shape
    hd = D // num_heads
    qkv = x @ params["wqkv"]
    qkv = qkv.reshape(B, N, 3, num_heads, hd).transpose(2, 0, 3, 1, 4)
    q, k, v = qkv[0], qkv[1], qkv[2]
    s = jnp.einsum("bhqd,bhkd->bhqk", q, k) * params["scale"]
    p = jax.nn.softmax(s, axis=-1)
    o = jnp.einsum("bhqk,bhkd->bhqd", p, v)
    o = o.transpose(0, 2, 1, 3).reshape(B, N, D)
    return o @ params["wproj"] + params["bproj"]


# ----------------------------------------------------------------------------
# Parameters (deterministic synthetic init)
# ----------------------------------------------------------------------------

def init_params(key, *, dim, num_heads):
    hd = dim // num_heads
    scale = hd ** (-0.5)

    def trunc(k, shape, std=0.02):
        return (std * jax.random.truncated_normal(k, -2.0, 2.0, shape)).astype(jnp.float32)

    k0, k1, k2 = jax.random.split(key, 3)
    wqkv = trunc(k0, (dim, 3 * dim))          # pre-transposed: y = x @ W
    wproj = trunc(k1, (dim, dim))
    bproj = trunc(k2, (1, dim))

    # Fold the attention scale into the Q output columns (free at build time).
    col_scale = jnp.concatenate(
        [jnp.full((dim,), scale, jnp.float32), jnp.ones((2 * dim,), jnp.float32)])
    wqkv_scaled = wqkv * col_scale[None, :]

    return {
        "wqkv": wqkv, "wproj": wproj, "bproj": bproj, "scale": scale,
        "wqkv_bf16_scaled": wqkv_scaled.astype(jnp.bfloat16),
        "wproj_bf16": wproj.astype(jnp.bfloat16),
    }


# ----------------------------------------------------------------------------
# Main
# ----------------------------------------------------------------------------

if __name__ == "__main__":
    B, N, D, H = 2, 16, 128, 4        # small shapes: batch=2, seq=16, dim=128, heads=4

    key = jax.random.PRNGKey(0)
    kx, kp = jax.random.split(key)
    x = jax.random.normal(kx, (B, N, D), dtype=jnp.float32)
    params = init_params(kp, dim=D, num_heads=H)

    # q_tile=kv_tile=8 so the online-softmax KV accumulation path (2x2 tiles)
    # is actually exercised at these toy shapes.
    out = attention_forward(x, params, num_heads=H, q_tile=8, kv_tile=8)
    out = jax.block_until_ready(out)

    assert out.shape == (B, N, D), out.shape
    assert bool(jnp.all(jnp.isfinite(out)))

    ref = attention_reference(x, params, num_heads=H)
    max_err = float(jnp.max(jnp.abs(out - ref)))
    assert bool(jnp.allclose(out, ref, atol=2e-2, rtol=2e-2)), max_err

    print("KERNEL_OK")
</pallas_src>

<mosaic_0001>
module attributes {stable_mosaic.version = 11 : i64} {
  func.func @_qkv_proj_kernel(%arg0: i32, %arg1: memref<32x128xbf16, #tpu.memory_space<vmem>>, %arg2: memref<128x384xbf16, #tpu.memory_space<vmem>>, %arg3: memref<32x384xbf16, #tpu.memory_space<vmem>>) attributes {dimension_semantics = [#tpu.dimension_semantics<parallel>], iteration_bounds = array<i64: 1>, scalar_prefetch = 0 : i64, scratch_operands = 0 : i64, tpu.core_type = #tpu.core_type<tc>, window_params = [{transform_indices = @transform_0, window_bounds = array<i64: 32, 128>}, {pipeline_mode = #tpu.pipeline_mode<synchronous>, transform_indices = @transform_1, window_bounds = array<i64: 128, 384>}, {transform_indices = @transform_2, window_bounds = array<i64: 32, 384>}]} {
    %c0 = arith.constant 0 : index
    %c0_0 = arith.constant 0 : index
    %0 = vector.load %arg1[%c0, %c0_0] : memref<32x128xbf16, #tpu.memory_space<vmem>>, vector<32x128xbf16>
    %c0_1 = arith.constant 0 : index
    %c0_2 = arith.constant 0 : index
    %1 = vector.load %arg2[%c0_1, %c0_2] : memref<128x384xbf16, #tpu.memory_space<vmem>>, vector<128x384xbf16>
    %cst = arith.constant dense<0.000000e+00> : vector<32x384xf32>
    %2 = tpu.matmul %0, %1, %cst {dimension_numbers = #tpu.dot_dimension_numbers<[1], [0], [0], [1], [0, 0, 1, 1], [], []>} : vector<32x128xbf16>, vector<128x384xbf16>, vector<32x384xf32> -> vector<32x384xf32>
    %3 = arith.truncf %2 : vector<32x384xf32> to vector<32x384xbf16>
    %c0_3 = arith.constant 0 : index
    %c0_4 = arith.constant 0 : index
    %4 = vector.load %arg3[%c0_3, %c0_4] : memref<32x384xbf16, #tpu.memory_space<vmem>>, vector<32x384xbf16>
    tpu.vector_store %arg3[%c0_3, %c0_4], %3 {strides = array<i32>} : memref<32x384xbf16, #tpu.memory_space<vmem>>, vector<32x384xbf16>,
    return
  }
  func.func @transform_0(%arg0: i32) -> (i32, i32) {
    %c0_i32 = arith.constant 0 : i32
    %c0_i32_0 = arith.constant 0 : i32
    return %arg0, %c0_i32 : i32, i32
  }
  func.func @transform_1(%arg0: i32) -> (i32, i32) {
    %c0_i32 = arith.constant 0 : i32
    %c0_i32_0 = arith.constant 0 : i32
    %c0_i32_1 = arith.constant 0 : i32
    return %c0_i32, %c0_i32_0 : i32, i32
  }
  func.func @transform_2(%arg0: i32) -> (i32, i32) {
    %c0_i32 = arith.constant 0 : i32
    %c0_i32_0 = arith.constant 0 : i32
    return %arg0, %c0_i32 : i32, i32
  }
}

</mosaic_0001>

<bundles_post_ra>
// kernel: tpu_custom_call.1
= control target key start
LH: loop header
LB: loop body
LE: loop exit
PB: predicated region body
PF: predicated region fallthrough
CT: control target
= control target key end

     0   :  { %7 = vsyncpa [#allocation3], 0  ;;  %s573_s0 = inlined_call_operand.hbm [shape: bf16[32,128], index: 0, kind: input, shape index: {}]   ;;  %s574_s1 = inlined_call_operand.hbm [shape: bf16[128,384], index: 1, kind: input, shape index: {}]   ;;  %s575_s2 = inlined_call_operand.hbm [shape: bf16[32,384], index: 2, kind: output, shape index: {}]  }
   0x1   :  { %8 = vsyncpa [#allocation6], 0 }
   0x2   :  { %9 = vsyncpa [#allocation4], 0  ;;  %s14_s11 = sshll.u32 %s573_s0, 4  ;;  %s536_s12 = smov [#allocation2]   ;;  %s15_s11 = int_to_ptr.hbm [resolvable:$true] %s14_s11 }
   0x3   :  { %s16_s13 = sshll.u32 %s536_s12, 4  ;;  %s27_s16 = sshll.u32 %s574_s1, 4  ;;  %s17_s13 = int_to_ptr.vmem [resolvable:$true] %s16_s13  ;;  %s28_s16 = int_to_ptr.hbm [resolvable:$true] %s27_s16 }
   0x4   :  { %s537_s17 = smov 64   ;;  %s538_s18 = smov 4  }
   0x5   :  { %22 = dma.hbm_to_vmem [thread:$0]  %s15_s11, 256, %s17_s13, [#allocation3], %s537_s17, %s537_s17, %s538_s18  }
   0x6   :  { %s539_s19 = smov [#allocation5]   ;;  %s540_s21 = smov 192  }
   0x7   :  { %s29_s20 = sshll.u32 %s539_s19, 4  ;;  %s541_s22 = smov 12   ;;  %s30_s20 = int_to_ptr.vmem [resolvable:$true] %s29_s20 }
   0x8   :  { %35 = dma.hbm_to_vmem [thread:$0]  %s28_s16, 3072, %s30_s20, [#allocation6], %s540_s21, %s540_s21, %s541_s22  }
   0x9   :  { %530 = dma.done.wait [#allocation3], 256  }
   0xa   :  { %531 = vsyncadd [#allocation3], 4294967040 }
   0xb   :  { %532 = dma.done.wait [#allocation6], 3072  }
   0xc   :  { %533 = vsyncadd [#allocation6], 4294964224  ;;  %v407_v0 = vld [vmem:[#allocation5 + $0xa8] sm:$0xf]  ;;  %v441_v1 = vld [vmem:[#allocation5 + $0xb0] sm:$0xf0] }
   0xd   :  { %v440_v2 = vld [vmem:[#allocation5 + $0xac] sm:$0xf]  ;;  %v408_v3 = vor.u32 %v441_v1, %v407_v0  ;;  %v409_v4 = vld [vmem:[#allocation5 + $0xb4] sm:$0xf0]  ;;  %v415_v5 = vld [vmem:[#allocation5 + $0xb0] sm:$0xf] }
   0xe   :  { %v442_v6 = vld [vmem:[#allocation5 + $0xb8] sm:$0xf0]  ;;  %v412_v7 = vor.u32 %v440_v2, %v409_v4  ;;  %v395_v9 = vld [vmem:[#allocation5 + $0x90] sm:$0xf]  ;;  %v437_v11 = vld [vmem:[#allocation5 + $0x94] sm:$0xf] }
   0xf   :  { %v416_v8 = vor.u32 %v442_v6, %v415_v5  ;;  %v438_v10 = vld [vmem:[#allocation5 + $0x98] sm:$0xf0]  ;;  %220 = vmatpush.bf16.msra.mxu0 %v408_v3  ;;  %v397_v13 = vld [vmem:[#allocation5 + $0x9c] sm:$0xf0]  ;;  %v403_v14 = vld [vmem:[#allocation5 + $0x98] sm:$0xf]  ;;  %443 = vmatpush.bf16.msra.mxu3 %v408_v3 }
  0x10   :  { %v396_v12 = vor.u32 %v438_v10, %v395_v9  ;;  %v439_v15 = vld [vmem:[#allocation5 + $0xa0] sm:$0xf0]  ;;  %239 = vmatpush.bf16.msra.mxu1 %v412_v7  ;;  %v400_v16 = vor.u32 %v437_v11, %v397_v13  ;;  %v383_v18 = vld [vmem:[#allocation5 + $0x78] sm:$0xf]  ;;  %v434_v20 = vld [vmem:[#allocation5 + $0x7c] sm:$0xf] }
  0x11   :  { %258 = vmatpush.bf16.msra.mxu2 %v416_v8  ;;  %v404_v17 = vor.u32 %v439_v15, %v403_v14  ;;  %v435_v19 = vld [vmem:[#allocation5 + $0x80] sm:$0xf0]  ;;  %v385_v21 = vld [vmem:[#allocation5 + $0x84] sm:$0xf0]  ;;  %v391_v22 = vld [vmem:[#allocation5 + $0x80] sm:$0xf] }
  0x12   :  { %v436_v23 = vld [vmem:[#allocation5 + $0x88] sm:$0xf0]  ;;  %v384_v24 = vor.u32 %v435_v19, %v383_v18  ;;  %v388_v25 = vor.u32 %v434_v20, %v385_v21  ;;  %v371_v27 = vld [vmem:[#allocation5 + $0x60] sm:$0xf]  ;;  %v431_v29 = vld [vmem:[#allocation5 + $0x64] sm:$0xf] }
  0x13   :  { %221 = vmatpush.bf16.msra.mxu0 %v396_v12  ;;  %444 = vmatpush.bf16.msra.mxu3 %v396_v12  ;;  %v392_v26 = vor.u32 %v436_v23, %v391_v22  ;;  %v432_v28 = vld [vmem:[#allocation5 + $0x68] sm:$0xf0]  ;;  %v373_v30 = vld [vmem:[#allocation5 + $0x6c] sm:$0xf0]  ;;  %v379_v31 = vld [vmem:[#allocation5 + $0x68] sm:$0xf] }
  0x14   :  { %240 = vmatpush.bf16.msra.mxu1 %v400_v16  ;;  %v433_v32 = vld [vmem:[#allocation5 + $0x70] sm:$0xf0]  ;;  %v372_v33 = vor.u32 %v432_v28, %v371_v27  ;;  %v376_v34 = vor.u32 %v431_v29, %v373_v30  ;;  %v359_v36 = vld [vmem:[#allocation5 + $0x48] sm:$0xf]  ;;  %v428_v38 = vld [vmem:[#allocation5 + $0x4c] sm:$0xf] }
  0x15   :  { %259 = vmatpush.bf16.msra.mxu2 %v404_v17  ;;  %v380_v35 = vor.u32 %v433_v32, %v379_v31  ;;  %v429_v37 = vld [vmem:[#allocation5 + $0x50] sm:$0xf0]  ;;  %v361_v39 = vld [vmem:[#allocation5 + $0x54] sm:$0xf0]  ;;  %v367_v40 = vld [vmem:[#allocation5 + $0x50] sm:$0xf] }
  0x16   :  { %v430_v41 = vld [vmem:[#allocation5 + $0x58] sm:$0xf0]  ;;  %v360_v42 = vor.u32 %v429_v37, %v359_v36  ;;  %v364_v43 = vor.u32 %v428_v38, %v361_v39  ;;  %v347_v45 = vld [vmem:[#allocation5 + $0x30] sm:$0xf]  ;;  %v425_v47 = vld [vmem:[#allocation5 + $0x34] sm:$0xf] }
  0x17   :  { %222 = vmatpush.bf16.msra.mxu0 %v384_v24  ;;  %445 = vmatpush.bf16.msra.mxu3 %v384_v24  ;;  %v368_v44 = vor.u32 %v430_v41, %v367_v40  ;;  %v426_v46 = vld [vmem:[#allocation5 + $0x38] sm:$0xf0]  ;;  %v349_v48 = vld [vmem:[#allocation5 + $0x3c] sm:$0xf0]  ;;  %v355_v49 = vld [vmem:[#allocation5 + $0x38] sm:$0xf] }
  0x18   :  { %241 = vmatpush.bf16.msra.mxu1 %v388_v25  ;;  %v427_v50 = vld [vmem:[#allocation5 + $0x40] sm:$0xf0]  ;;  %v348_v51 = vor.u32 %v426_v46, %v347_v45  ;;  %v352_v52 = vor.u32 %v425_v47, %v349_v48  ;;  %v335_v54 = vld [vmem:[#allocation5 + $0x18] sm:$0xf]  ;;  %v422_v56 = vld [vmem:[#allocation5 + $0x1c] sm:$0xf] }
  0x19   :  { %260 = vmatpush.bf16.msra.mxu2 %v392_v26  ;;  %v356_v53 = vor.u32 %v427_v50, %v355_v49  ;;  %v423_v55 = vld [vmem:[#allocation5 + $0x20] sm:$0xf0]  ;;  %v337_v57 = vld [vmem:[#allocation5 + $0x24] sm:$0xf0]  ;;  %v343_v58 = vld [vmem:[#allocation5 + $0x20] sm:$0xf] }
  0x1a   :  { %v424_v59 = vld [vmem:[#allocation5 + $0x28] sm:$0xf0]  ;;  %v336_v60 = vor.u32 %v423_v55, %v335_v54  ;;  %v340_v61 = vor.u32 %v422_v56, %v337_v57  ;;  %v323_v63 = vld [vmem:[#allocation5] sm:$0xf]  ;;  %v419_v1 = vld [vmem:[#allocation5 + $0x4] sm:$0xf] }
  0x1b   :  { %223 = vmatpush.bf16.msra.mxu0 %v372_v33  ;;  %446 = vmatpush.bf16.msra.mxu3 %v372_v33  ;;  %v344_v62 = vor.u32 %v424_v59, %v343_v58  ;;  %v420_v0 = vld [vmem:[#allocation5 + $0x8] sm:$0xf0]  ;;  %v325_v2 = vld [vmem:[#allocation5 + $0xc] sm:$0xf0]  ;;  %v331_v3 = vld [vmem:[#allocation5 + $0x8] sm:$0xf] }
  0x1c   :  { %242 = vmatpush.bf16.msra.mxu1 %v376_v34  ;;  %v421_v4 = vld [vmem:[#allocation5 + $0x10] sm:$0xf0]  ;;  %v324_v5 = vor.u32 %v420_v0, %v323_v63  ;;  %v328_v6 = vor.u32 %v419_v1, %v325_v2  ;;  %v418_v9 = vld [vmem:[#allocation2 + $0x8] sm:$0xff]  ;;  %s542_s0 = smov [#allocation7]   ;;  %s299_s25 = sshll.u32 %s575_s2, 4  ;;  %s300_s25 = int_to_ptr.hbm [resolvable:$true] %s299_s25 }
  0x1d   :  { %261 = vmatpush.bf16.msra.mxu2 %v380_v35  ;;  %v332_v7 = vor.u32 %v421_v4, %v331_v3  ;;  %v417_v8 = vld [vmem:[#allocation2] sm:$0xff]  ;;  %s297_s1 = sshll.u32 %s542_s0, 4  ;;  %s298_s1 = int_to_ptr.vmem [resolvable:$true] %s297_s1 }
  0x1f   :  { %224 = vmatpush.bf16.msra.mxu0 %v360_v42  ;;  %447 = vmatpush.bf16.msra.mxu3 %v360_v42 }
  0x20   :  { %243 = vmatpush.bf16.msra.mxu1 %v364_v43 }
  0x21   :  { %262 = vmatpush.bf16.msra.mxu2 %v368_v44 }
  0x23   :  { %225 = vmatpush.bf16.msra.mxu0 %v348_v51  ;;  %448 = vmatpush.bf16.msra.mxu3 %v348_v51 }
  0x24   :  { %244 = vmatpush.bf16.msra.mxu1 %v352_v52 }
  0x25   :  { %263 = vmatpush.bf16.msra.mxu2 %v356_v53 }
  0x27   :  { %226 = vmatpush.bf16.msra.mxu0 %v336_v60  ;;  %449 = vmatpush.bf16.msra.mxu3 %v336_v60 }
  0x28   :  { %245 = vmatpush.bf16.msra.mxu1 %v340_v61 }
  0x29   :  { %264 = vmatpush.bf16.msra.mxu2 %v344_v62 }
  0x2b   :  { %227 = vmatpush.bf16.msra.mxu0 %v324_v5  ;;  %450 = vmatpush.bf16.msra.mxu3 %v324_v5 }
  0x2c   :  { %246 = vmatpush.bf16.msra.mxu1 %v328_v6 }
  0x2d   :  { %265 = vmatpush.bf16.msra.mxu2 %v332_v7 }
  0x2e   :  { %228 = vmatmul.bf16.vlgmr.msra.gmra.mxu0 %v417_v8  ;;  %233 = vmatmul.bf16.vlgmr.msra.gmra.mxu3 %v418_v9 }
  0x2f   :  { %247 = vmatmul.bf16.vlgmr.msra.gmra.mxu1 %v417_v8 }
  0x30   :  { %266 = vmatmul.bf16.vlgmr.msra.gmra.mxu2 %v417_v8 }
  0x3f   :  { %252 = vmatmul.bf16.gmra.mxu1 %v418_v9 }
  0x40   :  { %271 = vmatmul.bf16.gmra.mxu2 %v418_v9 }
  0xab   :  { %v229_v10 = vpop.f32.mrf.mxu0 }
  0xac   :  { %v248_v11 = vpop.f32.mrf.mxu1 }
  0xad   :  { %v277_v12 = vpack.c.bf16 %v248_v11, %v229_v10 }
  0xaf   :  { %285 = vst [vmem:[#allocation7] sm:$0xff] %v277_v12 }
  0xb1   :  { %v234_v18 = vpop.f32.mrf.mxu3 }
  0xb3   :  { %v267_v13 = vpop.f32.mrf.mxu2  ;;  %v231_v15 = vpop.f32.mrf.mxu0 }
  0xb4   :  { %v278_v14 = vpack.c.bf16 %v267_v13, %v267_v13  ;;  %v250_v16 = vpop.f32.mrf.mxu1 }
  0xb5   :  { %v279_v17 = vpack.c.bf16 %v250_v16, %v231_v15 }
  0xb6   :  { %286 = vst [vmem:[#allocation7 + $0x8] sm:$0xf] %v278_v14 }
  0xb7   :  { %287 = vst [vmem:[#allocation7 + $0xc] sm:$0xff] %v279_v17 }
  0xb9   :  { %v236_v25 = vpop.f32.mrf.mxu3 }
  0xbb   :  { %v269_v19 = vpop.f32.mrf.mxu2 }
  0xbc   :  { %v280_v20 = vpack.c.bf16 %v269_v19, %v269_v19  ;;  %v253_v21 = vpop.f32.mrf.mxu1 }
  0xbd   :  { %v281_v22 = vpack.c.bf16 %v253_v21, %v234_v18 }
  0xbe   :  { %288 = vst [vmem:[#allocation7 + $0x14] sm:$0xf] %v280_v20 }
  0xbf   :  { %289 = vst [vmem:[#allocation7 + $0x18] sm:$0xff] %v281_v22 }
  0xc3   :  { %v272_v23 = vpop.f32.mrf.mxu2 }
  0xc4   :  { %v282_v24 = vpack.c.bf16 %v272_v23, %v272_v23  ;;  %v255_v26 = vpop.f32.mrf.mxu1 }
  0xc5   :  { %v283_v27 = vpack.c.bf16 %v255_v26, %v236_v25 }
  0xc6   :  { %290 = vst [vmem:[#allocation7 + $0x20] sm:$0xf] %v282_v24 }
  0xc7   :  { %291 = vst [vmem:[#allocation7 + $0x24] sm:$0xff] %v283_v27 }
  0xcb   :  { %v274_v28 = vpop.f32.mrf.mxu2 }
  0xcc   :  { %v284_v29 = vpack.c.bf16 %v274_v28, %v274_v28 }
  0xce   :  { %292 = vst [vmem:[#allocation7 + $0x2c] sm:$0xf] %v284_v29 }
  0xcf   :  { %305 = dma.vmem_to_hbm [thread:$0]  %s298_s1, 768, %s300_s25, [#allocation4], %s540_s21, %s540_s21, %s541_s22  }
  0xd0   :  { %534 = dma.done.wait [#allocation4], 768  }
  0xd1   :  { %535 = vsyncadd [#allocation4], 4294966528 }
  0xd2   :  { %310 = vsyncpa [#allocation3], 1 }
  0xd3   :  { %311 = vsyncpa [#allocation6], 1 }
  0xd4   :  { %312 = vsyncpa [#allocation4], 1 }

</bundles_post_ra>
